<compile_context>
chip_gen: v7x
topology: tpu7x:2x2x1
jax: 0.10.0
libtpu: 0.0.40
codegen_flags: <defaults>
</compile_context>

<pallas_src>
import numpy as np
import jax
import jax.numpy as jnp
from jax import lax
from jax.experimental import pallas as pl
from jax.experimental.pallas import tpu as pltpu

L2_REG = 0.02
_NEG_LARGE = -1e30  # exp() underflows to exactly 0.0 for masked entries


def _round_up(x, m):
    return ((x + m - 1) // m) * m


# ----------------------------- host-side glue ------------------------------
def get_n_pairs(labels_np):
    """Mirror of NPairLoss.get_n_pairs (numpy, host side)."""
    # TODO(synk): np.random.choice-based pair selection has no Pallas equivalent; kept on host.
    labels_np = np.asarray(labels_np)
    n_pairs = []
    for label in sorted(set(labels_np.tolist())):
        label_indices = np.where(labels_np == label)[0]
        if len(label_indices) < 2:
            continue
        anchor, positive = np.random.choice(label_indices, 2, replace=False)
        n_pairs.append([anchor, positive])
    n_pairs = np.array(n_pairs, dtype=np.int64)
    n_negatives = []
    for i in range(len(n_pairs)):
        negative = np.concatenate([n_pairs[:i, 1], n_pairs[i + 1:, 1]])
        n_negatives.append(negative)
    n_negatives = np.array(n_negatives, dtype=np.int64)
    return n_pairs, n_negatives


# ------------------------------ Pallas kernel ------------------------------
def _npair_loss_kernel(n_ref, a_ref, p_ref, out_ref, acc_ref):
    # n_ref   : SMEM (1,)   int32 -- true (unpadded) number of pairs
    # a_ref   : VMEM (TM,Dp) f32  -- row tile of padded anchors
    # p_ref   : VMEM (Np,Dp) f32  -- full padded positives (resident)
    # out_ref : SMEM (1,1)  f32   -- scalar loss
    # acc_ref : SMEM (2,)   f32   -- [sum_i log(1+..), sum(a^2)+sum(p^2)]
    i = pl.program_id(0)
    tm = a_ref.shape[0]
    np_rows = p_ref.shape[0]
    n_act = n_ref[0]

    @pl.when(i == 0)
    def _init():
        acc_ref[0] = jnp.float32(0.0)
        acc_ref[1] = jnp.float32(0.0)

    a = a_ref[...]                        # (TM, Dp)
    p = p_ref[...]                        # (Np, Dp)

    # MXU: logits[r, j] = a_r . p_j
    logits = jnp.dot(a, p.T, preferred_element_type=jnp.float32)   # (TM, Np)

    rows = lax.broadcasted_iota(jnp.int32, (tm, np_rows), 0) + i * tm
    cols = lax.broadcasted_iota(jnp.int32, (tm, np_rows), 1)

    # diag[r] = a_r . p_r  (global row index)
    diag = jnp.sum(jnp.where(rows == cols, logits, 0.0), axis=1, keepdims=True)

    # x[r, j] = a_r . (p_j - p_r); valid only for real rows/cols with j != r
    valid = (rows != cols) & (cols < n_act) & (rows < n_act)
    x = jnp.where(valid, logits - diag, jnp.float32(_NEG_LARGE))

    row_sum = jnp.sum(jnp.exp(x), axis=1, keepdims=True)            # (TM, 1)
    npair_part = jnp.sum(jnp.log(1.0 + row_sum))   # padded rows add log(1)=0

    # l2 partial: padded rows are zero, so no masking needed
    row0 = pl.multiple_of(i * tm, tm)
    p_tile = p_ref[pl.ds(row0, tm), :]
    l2_part = jnp.sum(a * a) + jnp.sum(p_tile * p_tile)

    acc_ref[0] = acc_ref[0] + npair_part
    acc_ref[1] = acc_ref[1] + l2_part

    @pl.when(i == pl.num_programs(0) - 1)
    def _finalize():
        inv_n = 1.0 / n_act.astype(jnp.float32)
        # mean npair + L2_REG * (l2_sum / n), scaled once on scalars
        out_ref[0, 0] = (acc_ref[0] + L2_REG * acc_ref[1]) * inv_n


def npair_loss_pallas(anchors, positives):
    """N-pair loss from gathered anchors/positives (negatives are implicit)."""
    anchors = jnp.asarray(anchors, jnp.float32)
    positives = jnp.asarray(positives, jnp.float32)
    n, d = anchors.shape

    tm = 128 if n > 128 else 8            # sublane-aligned row tile
    n_pad = _round_up(max(n, 1), tm)      # fixed bucket for rows
    d_pad = _round_up(d, 128)             # lane-aligned contraction dim

    a_p = jnp.zeros((n_pad, d_pad), jnp.float32).at[:n, :d].set(anchors)
    p_p = jnp.zeros((n_pad, d_pad), jnp.float32).at[:n, :d].set(positives)
    n_arr = jnp.array([n], dtype=jnp.int32)

    grid_m = n_pad // tm

    grid_spec = pltpu.PrefetchScalarGridSpec(
        num_scalar_prefetch=1,
        grid=(grid_m,),
        in_specs=[
            pl.BlockSpec((tm, d_pad), lambda i, n_s: (i, 0)),      # anchor row tile
            pl.BlockSpec((n_pad, d_pad), lambda i, n_s: (0, 0)),   # positives resident
        ],
        out_specs=pl.BlockSpec((1, 1), lambda i, n_s: (0, 0),
                               memory_space=pltpu.MemorySpace.SMEM),
        scratch_shapes=[pltpu.SMEM((2,), jnp.float32)],
    )

    out = pl.pallas_call(
        _npair_loss_kernel,
        out_shape=jax.ShapeDtypeStruct((1, 1), jnp.float32),
        grid_spec=grid_spec,
        compiler_params=pltpu.CompilerParams(
            dimension_semantics=("arbitrary",),   # scalar accumulation across tiles
            vmem_limit_bytes=32 * 1024 * 1024,
        ),
    )(n_arr, a_p, p_p)
    return out[0, 0]


def npair_loss_forward(embeddings, target_np):
    """Full NPairLoss.forward: host index construction + gather + Pallas loss."""
    n_pairs, _ = get_n_pairs(target_np)
    anchors = embeddings[n_pairs[:, 0]]        # (n, D)
    positives = embeddings[n_pairs[:, 1]]      # (n, D)
    # negatives[i] == positives of the other pairs -> handled inside the kernel
    return npair_loss_pallas(anchors, positives)


# ------------------------------ reference ----------------------------------
def npair_loss_ref(anchors, positives, negatives):
    """Pure-JAX mirror of the PyTorch module (explicit negatives)."""
    x = jnp.matmul(anchors[:, None, :],
                   jnp.transpose(negatives - positives[:, None, :], (0, 2, 1)))
    x = jnp.sum(jnp.exp(x), axis=2)
    npair = jnp.mean(jnp.log(1.0 + x))
    l2 = jnp.sum(anchors ** 2 + positives ** 2) / anchors.shape[0]
    return npair + L2_REG * l2


if __name__ == "__main__":
    np.random.seed(0)  # deterministic pair selection (mirrors np.random.choice)

    batch, dim = 8, 32
    key = jax.random.PRNGKey(0)
    embeddings = jax.random.normal(key, (batch, dim), dtype=jnp.float32)
    target = np.array([0, 0, 1, 1, 2, 2, 3, 3], dtype=np.int64)

    loss = npair_loss_forward(embeddings, target)
    loss = jax.block_until_ready(loss)

    # Reference with the SAME pairs (reseed -> identical np.random.choice
    # draws), using the original explicit-negatives formulation. This also
    # validates the negatives == other-pairs'-positives invariant the kernel
    # relies on.
    np.random.seed(0)
    n_pairs, n_negatives = get_n_pairs(target)
    ref = npair_loss_ref(embeddings[n_pairs[:, 0]],
                         embeddings[n_pairs[:, 1]],
                         embeddings[n_negatives])
    assert np.allclose(np.asarray(loss), np.asarray(ref), rtol=1e-5, atol=1e-5), (
        float(loss), float(ref))

    print("KERNEL_OK")
</pallas_src>

<mosaic_0001>
module attributes {stable_mosaic.version = 11 : i64} {
  func.func @_npair_loss_kernel(%arg0: i32, %arg1: memref<1xi32, #tpu.memory_space<smem>>, %arg2: memref<8x128xf32, #tpu.memory_space<vmem>>, %arg3: memref<8x128xf32, #tpu.memory_space<vmem>>, %arg4: memref<1x1xf32, #tpu.memory_space<smem>>, %arg5: memref<2xf32, #tpu.memory_space<smem>>) attributes {dimension_semantics = [#tpu.dimension_semantics<arbitrary>], iteration_bounds = array<i64: 1>, scalar_prefetch = 1 : i64, scratch_operands = 1 : i64, tpu.core_type = #tpu.core_type<tc>, window_params = [{transform_indices = @transform_0, window_bounds = array<i64: 8, 128>}, {pipeline_mode = #tpu.pipeline_mode<synchronous>, transform_indices = @transform_1, window_bounds = array<i64: 8, 128>}, {transform_indices = @transform_2, window_bounds = array<i64: 1, 1>}]} {
    %c0 = arith.constant 0 : index
    %0 = memref.load %arg1[%c0] : memref<1xi32, #tpu.memory_space<smem>>
    %c0_i32 = arith.constant 0 : i32
    %1 = arith.cmpi eq, %arg0, %c0_i32 : i32
    %2 = arith.extui %1 : i1 to i32
    %c0_i32_0 = arith.constant 0 : i32
    %3 = arith.cmpi ne, %2, %c0_i32_0 : i32
    scf.if %3 {
      %cst_20 = arith.constant 0.000000e+00 : f32
      %c0_21 = arith.constant 0 : index
      %63 = memref.load %arg5[%c0_21] : memref<2xf32, #tpu.memory_space<smem>>
      memref.store %cst_20, %arg5[%c0_21] : memref<2xf32, #tpu.memory_space<smem>>
      %cst_22 = arith.constant 0.000000e+00 : f32
      %c1_23 = arith.constant 1 : index
      %64 = memref.load %arg5[%c1_23] : memref<2xf32, #tpu.memory_space<smem>>
      memref.store %cst_22, %arg5[%c1_23] : memref<2xf32, #tpu.memory_space<smem>>
    } else {
    }
    %c0_1 = arith.constant 0 : index
    %c0_2 = arith.constant 0 : index
    %4 = vector.load %arg2[%c0_1, %c0_2] : memref<8x128xf32, #tpu.memory_space<vmem>>, vector<8x128xf32>
    %c0_3 = arith.constant 0 : index
    %c0_4 = arith.constant 0 : index
    %5 = vector.load %arg3[%c0_3, %c0_4] : memref<8x128xf32, #tpu.memory_space<vmem>>, vector<8x128xf32>
    %6 = tpu.transpose %5, [1, 0] : vector<8x128xf32> -> vector<128x8xf32>
    %cst = arith.constant dense<0.000000e+00> : vector<8x8xf32>
    %7 = tpu.matmul %4, %6, %cst {dimension_numbers = #tpu.dot_dimension_numbers<[1], [0], [0], [1], [0, 0, 1, 1], [], []>} : vector<8x128xf32>, vector<128x8xf32>, vector<8x8xf32> -> vector<8x8xf32>
    %8 = tpu.iota {dimensions = array<i32: 0>} : vector<8x8xi32>
    %c8_i32 = arith.constant 8 : i32
    %9 = arith.muli %arg0, %c8_i32 : i32
    %10 = vector.broadcast %9 : i32 to vector<8x8xi32>
    %11 = arith.addi %8, %10 : vector<8x8xi32>
    %12 = tpu.iota {dimensions = array<i32: 1>} : vector<8x8xi32>
    %13 = arith.cmpi eq, %11, %12 : vector<8x8xi32>
    %cst_5 = arith.constant 0.000000e+00 : f32
    %14 = vector.broadcast %cst_5 : f32 to vector<8x8xf32>
    %15 = arith.select %13, %7, %14 : vector<8x8xi1>, vector<8x8xf32>
    %cst_6 = arith.constant dense<0.000000e+00> : vector<8xf32>
    %16 = vector.multi_reduction <add>, %15, %cst_6 [1] : vector<8x8xf32> to vector<8xf32>
    %17 = vector.shape_cast %16 : vector<8xf32> to vector<8x1xf32>
    %18 = arith.cmpi ne, %11, %12 : vector<8x8xi32>
    %19 = vector.broadcast %0 : i32 to vector<8x8xi32>
    %20 = arith.cmpi slt, %12, %19 : vector<8x8xi32>
    %21 = arith.andi %18, %20 : vector<8x8xi1>
    %22 = vector.broadcast %0 : i32 to vector<8x8xi32>
    %23 = arith.cmpi slt, %11, %22 : vector<8x8xi32>
    %24 = arith.andi %21, %23 : vector<8x8xi1>
    %25 = vector.broadcast %17 : vector<8x1xf32> to vector<8x8xf32>
    %26 = arith.subf %7, %25 : vector<8x8xf32>
    %cst_7 = arith.constant -1.000000e+30 : f32
    %27 = vector.broadcast %cst_7 : f32 to vector<8x8xf32>
    %28 = arith.select %24, %26, %27 : vector<8x8xi1>, vector<8x8xf32>
    %29 = math.exp %28 : vector<8x8xf32>
    %cst_8 = arith.constant dense<0.000000e+00> : vector<8xf32>
    %30 = vector.multi_reduction <add>, %29, %cst_8 [1] : vector<8x8xf32> to vector<8xf32>
    %31 = vector.shape_cast %30 : vector<8xf32> to vector<8x1xf32>
    %cst_9 = arith.constant 1.000000e+00 : f32
    %32 = vector.broadcast %cst_9 : f32 to vector<8x1xf32>
    %33 = arith.addf %32, %31 : vector<8x1xf32>
    %34 = math.log %33 : vector<8x1xf32>
    %35 = vector.shape_cast %34 : vector<8x1xf32> to vector<1x8x1xf32>
    %cst_10 = arith.constant dense<0.000000e+00> : vector<1xf32>
    %36 = vector.multi_reduction <add>, %35, %cst_10 [1, 2] : vector<1x8x1xf32> to vector<1xf32>
    %37 = vector.shape_cast %36 : vector<1xf32> to vector<1x1x1xf32>
    %38 = vector.extract %37[0, 0, 0] : f32 from vector<1x1x1xf32>
    %c8_i32_11 = arith.constant 8 : i32
    %39 = arith.muli %arg0, %c8_i32_11 : i32
    %40 = tpu.assume_multiple %39, 8 : i32
    %41 = arith.index_cast %40 : i32 to index
    %c0_12 = arith.constant 0 : index
    %42 = vector.load %arg3[%41, %c0_12] : memref<8x128xf32, #tpu.memory_space<vmem>>, vector<8x128xf32>
    %43 = arith.mulf %4, %4 : vector<8x128xf32>
    %44 = vector.shape_cast %43 : vector<8x128xf32> to vector<1x8x128xf32>
    %cst_13 = arith.constant dense<0.000000e+00> : vector<1xf32>
    %45 = vector.multi_reduction <add>, %44, %cst_13 [1, 2] : vector<1x8x128xf32> to vector<1xf32>
    %46 = vector.shape_cast %45 : vector<1xf32> to vector<1x1x1xf32>
    %47 = vector.extract %46[0, 0, 0] : f32 from vector<1x1x1xf32>
    %48 = arith.mulf %42, %42 : vector<8x128xf32>
    %49 = vector.shape_cast %48 : vector<8x128xf32> to vector<1x8x128xf32>
    %cst_14 = arith.constant dense<0.000000e+00> : vector<1xf32>
    %50 = vector.multi_reduction <add>, %49, %cst_14 [1, 2] : vector<1x8x128xf32> to vector<1xf32>
    %51 = vector.shape_cast %50 : vector<1xf32> to vector<1x1x1xf32>
    %52 = vector.extract %51[0, 0, 0] : f32 from vector<1x1x1xf32>
    %53 = arith.addf %47, %52 : f32
    %c0_15 = arith.constant 0 : index
    %54 = memref.load %arg5[%c0_15] : memref<2xf32, #tpu.memory_space<smem>>
    %55 = arith.addf %54, %38 : f32
    %c0_16 = arith.constant 0 : index
    %56 = memref.load %arg5[%c0_16] : memref<2xf32, #tpu.memory_space<smem>>
    memref.store %55, %arg5[%c0_16] : memref<2xf32, #tpu.memory_space<smem>>
    %c1 = arith.constant 1 : index
    %57 = memref.load %arg5[%c1] : memref<2xf32, #tpu.memory_space<smem>>
    %58 = arith.addf %57, %53 : f32
    %c1_17 = arith.constant 1 : index
    %59 = memref.load %arg5[%c1_17] : memref<2xf32, #tpu.memory_space<smem>>
    memref.store %58, %arg5[%c1_17] : memref<2xf32, #tpu.memory_space<smem>>
    %c0_i32_18 = arith.constant 0 : i32
    %60 = arith.cmpi eq, %arg0, %c0_i32_18 : i32
    %61 = arith.extui %60 : i1 to i32
    %c0_i32_19 = arith.constant 0 : i32
    %62 = arith.cmpi ne, %61, %c0_i32_19 : i32
    scf.if %62 {
      %63 = arith.sitofp %0 : i32 to f32
      %cst_20 = arith.constant 1.000000e+00 : f32
      %64 = arith.divf %cst_20, %63 : f32
      %c0_21 = arith.constant 0 : index
      %65 = memref.load %arg5[%c0_21] : memref<2xf32, #tpu.memory_space<smem>>
      %c1_22 = arith.constant 1 : index
      %66 = memref.load %arg5[%c1_22] : memref<2xf32, #tpu.memory_space<smem>>
      %cst_23 = arith.constant 2.000000e-02 : f32
      %67 = arith.mulf %cst_23, %66 : f32
      %68 = arith.addf %65, %67 : f32
      %69 = arith.mulf %68, %64 : f32
      %c0_24 = arith.constant 0 : index
      %c0_25 = arith.constant 0 : index
      %70 = memref.load %arg4[%c0_24, %c0_25] : memref<1x1xf32, #tpu.memory_space<smem>>
      memref.store %69, %arg4[%c0_24, %c0_25] : memref<1x1xf32, #tpu.memory_space<smem>>
    } else {
    }
    return
  }
  func.func @transform_0(%arg0: i32, %arg1: memref<1xi32, #tpu.memory_space<smem>>) -> (i32, i32) {
    %c0_i32 = arith.constant 0 : i32
    %c0_i32_0 = arith.constant 0 : i32
    return %arg0, %c0_i32 : i32, i32
  }
  func.func @transform_1(%arg0: i32, %arg1: memref<1xi32, #tpu.memory_space<smem>>) -> (i32, i32) {
    %c0_i32 = arith.constant 0 : i32
    %c0_i32_0 = arith.constant 0 : i32
    %c0_i32_1 = arith.constant 0 : i32
    return %c0_i32, %c0_i32_0 : i32, i32
  }
  func.func @transform_2(%arg0: i32, %arg1: memref<1xi32, #tpu.memory_space<smem>>) -> (i32, i32) {
    %c0_i32 = arith.constant 0 : i32
    %c0_i32_0 = arith.constant 0 : i32
    %c0_i32_1 = arith.constant 0 : i32
    return %c0_i32, %c0_i32_0 : i32, i32
  }
}

</mosaic_0001>

<bundles_post_ra>
// kernel: tpu_custom_call.1
= control target key start
LH: loop header
LB: loop body
LE: loop exit
PB: predicated region body
PF: predicated region fallthrough
CT: control target
= control target key end

     0   :  { %9 = vsyncpa [#allocation6], 0  ;;  %s374_s0 = inlined_call_operand.<no memory space> [shape: s32[1], index: 0, kind: input, shape index: {}]   ;;  %s375_s1 = inlined_call_operand.hbm [shape: f32[8,128], index: 1, kind: input, shape index: {}]   ;;  %s376_s2 = inlined_call_operand.hbm [shape: f32[8,128], index: 2, kind: input, shape index: {}]   ;;  %s377_s3 = inlined_call_operand.hbm [shape: f32[1,1], index: 3, kind: output, shape index: {}]  }
   0x1   :  { %10 = vsyncpa [#allocation9], 0 }
   0x2   :  { %11 = vsyncpa [#allocation7], 0  ;;  %s307_s12 = smov [#allocation5]   ;;  %s308_s14 = smov [#allocation8]  }
   0x3   :  { %s18_s13 = sshll.u32 %s307_s12, 4  ;;  %s28_s15 = sshll.u32 %s308_s14, 4  ;;  %s19_s13 = int_to_ptr.vmem [resolvable:$true] %s18_s13  ;;  %s29_s15 = int_to_ptr.vmem [resolvable:$true] %s28_s15 }
   0x4   :  { %s247_s18 = scalar_lea.hbm %s375_s1, 128 }
   0x5   :  { %p248_p0 = scmp.ne.s32.totalorder %s375_s1, %s247_s18  ;;  %p251_p1 = scmp.lt.u32.totalorder %s247_s18, %s375_s1 }
   0x7   :  { %p253_p2 = pnand %p251_p1, %p248_p0 }
   0x9   :  { %256 = shalt.err (!%p253_p2)
}
   0xa   :  { %s257_s23 = scalar_lea.vmem %s19_s13, 128  ;;  %p262_p4 = scmp.lt.s32.totalorder %s19_s13, %s19_s13 }
   0xb   :  { %p258_p3 = scmp.ne.s32.totalorder %s19_s13, %s257_s23  ;;  %p263_p5 = scmp.lt.s32.totalorder %s257_s23, %s257_s23 }
   0xd   :  { %p264_p6 = por %p263_p5, %p262_p4 }
   0xf   :  { %p265_p7 = pnand %p264_p6, %p258_p3 }
  0x11   :  { %268 = shalt.err (!%p265_p7)
}
  0x12   :  { %21 = dma.hbm_to_vmem [thread:$0]  %s375_s1, 128, %s19_s13, [#allocation6]  }
  0x13   :  { %s269_s28 = scalar_lea.hbm %s376_s2, 128 }
  0x14   :  { %p270_p8 = scmp.ne.s32.totalorder %s376_s2, %s269_s28  ;;  %p273_p9 = scmp.lt.u32.totalorder %s269_s28, %s376_s2 }
  0x16   :  { %p275_p10 = pnand %p273_p9, %p270_p8 }
  0x18   :  { %278 = shalt.err (!%p275_p10)
}
  0x19   :  { %s279_s6 = scalar_lea.vmem %s29_s15, 128  ;;  %p284_p12 = scmp.lt.s32.totalorder %s29_s15, %s29_s15 }
  0x1a   :  { %p280_p11 = scmp.ne.s32.totalorder %s29_s15, %s279_s6  ;;  %p285_p13 = scmp.lt.s32.totalorder %s279_s6, %s279_s6 }
  0x1c   :  { %p286_p0 = por %p285_p13, %p284_p12 }
  0x1e   :  { %p287_p1 = pnand %p286_p0, %p280_p11 }
  0x20   :  { %290 = shalt.err (!%p287_p1)
}
  0x21   :  { %31 = dma.hbm_to_vmem [thread:$0]  %s376_s2, 128, %s29_s15, [#allocation9]  }
  0x22   :  { %301 = dma.done.wait [#allocation6], 128  }
  0x23   :  { %302 = vsyncadd [#allocation6], 4294967168 }
  0x24   :  { %303 = dma.done.wait [#allocation9], 128  }
  0x25   :  { %304 = vsyncadd [#allocation9], 4294967168  ;;  %v309_v0 = vmov 0.0   ;;  %vm310_vm0 = vmmov 0   ;;  %v48_v1 = vld [vmem:[#allocation8] sm:$0xff]  ;;  %v47_v2 = vld [vmem:[#allocation5] sm:$0xff]  ;;  %v119_v3 = vlaneseq  ;;  %v133_v6 = vstv %s374_s0  ;;  %s193_s11 = scvt.s32.f32 %s374_s0 }
  0x26   :  { %223 = vmatprep.subr.mxu0 %v309_v0  ;;  %225 = vmatprep.mubr.msk.f32.mxu0 %vm310_vm0, %v309_v0  ;;  %vm128_vm7 = vcmask 64512   ;;  %v171_v17 = vmul.f32 %v48_v1, %v48_v1  ;;  %vm148_vm8 = vcmask 7168   ;;  %v161_v23 = vmul.f32 %v47_v2, %v47_v2  ;;  %s291_s21 = scalar_lea.hbm %s377_s3, 16 }
  0x27   :  { %224 = vmatpush3.xpose.msra.mxu0 %v48_v1  ;;  %v120_v4 = vshrl.u32 %v119_v3, 7  ;;  %v125_v5 = vand.u32 127, %v119_v3  ;;  %v194_v30 = vstv %s193_s11  ;;  %p292_p2 = scmp.ne.s32.totalorder %s377_s3, %s291_s21  ;;  %p295_p3 = scmp.lt.u32.totalorder %s291_s21, %s377_s3 }
  0x29   :  { %vm132_vm1 = vcmp.ne.s32.totalorder %v120_v4, %v125_v5  ;;  %vm134_vm2 = vcmp.lt.s32.totalorder %v125_v5, %v133_v6  ;;  %vm136_vm3 = vcmp.lt.s32.totalorder %v120_v4, %v133_v6  ;;  %vm126_vm6 = vcmp.eq.s32.totalorder %v120_v4, %v125_v5  ;;  %p297_p4 = pnand %p295_p3, %p292_p2 }
  0x2a   :  { %226 = vmatmul.mubr.f32.vlgmr.msra.gmra.mrb[0].mxu0 %v47_v2  ;;  %vm135_vm4 = vmand %vm132_vm1, %vm134_vm2 }
  0x2b   :  { %vm137_vm5 = vmand %vm135_vm4, %vm136_vm3 }
  0xfd   :  { %v115_v7 = vpop.f32.mrb[0].mxu0 }
  0xfe   :  { %v227_v8 = vpop.f32.mrb[1].mxu0  ;;  %v127_v9 = vsel %vm126_vm6, %v115_v7, 0.0 }
  0xff   :  { %v129_v10 = vsel %vm128_vm7, %v127_v9, 0.0 }
 0x100   :  { %130 = vadd.xlane.f32.xlu0 %v129_v10 }
 0x18d   :  { %v131_v11 = vpop.xlane.xlu0 %130 }
 0x18e   :  { %v138_v12 = vsub.f32 %v115_v7, %v131_v11 }
 0x190   :  { %v139_v13 = vsel %vm137_vm5, %v138_v12, -1e+30 }
 0x191   :  { %v140_v14 = vmul.f32 1.442695, %v139_v13 }
 0x193   :  { %241 = vpow2.f32 %v140_v14 }
 0x19d   :  { %v242_v15 = vpop.eup %241 }
 0x19e   :  { %v142_v16 = vsel %vm128_vm7, %v242_v15, 0.0 }
 0x19f   :  { %143 = vadd.xlane.f32.xlu0 %v142_v16 }
 0x1a3   :  { %172 = vadd.xlane.f32.xlu0 %v171_v17 }
 0x22c   :  { %v144_v18 = vpop.xlane.xlu0 %143 }
 0x22d   :  { %v145_v19 = vadd.f32 1.0, %v144_v18 }
 0x22f   :  { %243 = vlog2.f32 %v145_v19 }
 0x230   :  { %v173_v24 = vpop.xlane.xlu0 %172  ;;  %245 = vrcp.f32 %v194_v30 }
 0x231   :  { %v174_v25 = vrot.slane %v173_v24, 4 }
 0x233   :  { %v175_v26 = vadd.f32 %v174_v25, %v173_v24 }
 0x235   :  { %v176_v31 = vrot.slane %v175_v26, 2 }
 0x237   :  { %v177_v37 = vadd.f32 %v176_v31, %v175_v26 }
 0x239   :  { %v244_v20 = vpop.eup %243  ;;  %v178_v42 = vrot.slane %v177_v37, 1 }
 0x23a   :  { %v147_v21 = vmul.f32 0.6931472, %v244_v20  ;;  %v246_v45 = vpop.eup %245 }
 0x23b   :  { %v179_v46 = vadd.f32 %v178_v42, %v177_v37 }
 0x23c   :  { %v149_v22 = vsel %vm148_vm8, %v147_v21, 0.0 }
 0x23d   :  { %150 = vadd.xlane.f32.xlu1 %v149_v22 }
 0x241   :  { %162 = vadd.xlane.f32.xlu1 %v161_v23 }
 0x2ca   :  { %v151_v27 = vpop.xlane.xlu1 %150 }
 0x2cb   :  { %v152_v28 = vrot.slane %v151_v27, 4 }
 0x2cd   :  { %v153_v29 = vadd.f32 %v152_v28, %v151_v27 }
 0x2ce   :  { %v163_v32 = vpop.xlane.xlu1 %162 }
 0x2cf   :  { %v154_v33 = vrot.slane %v153_v29, 2  ;;  %v164_v34 = vrot.slane %v163_v32, 4 }
 0x2d1   :  { %v165_v35 = vadd.f32 %v164_v34, %v163_v32  ;;  %v155_v36 = vadd.f32 %v154_v33, %v153_v29 }
 0x2d3   :  { %v166_v38 = vrot.slane %v165_v35, 2  ;;  %v156_v39 = vrot.slane %v155_v36, 1 }
 0x2d5   :  { %v167_v40 = vadd.f32 %v166_v38, %v165_v35  ;;  %v157_v41 = vadd.f32 %v156_v39, %v155_v36 }
 0x2d7   :  { %228 = vpush %v157_v41  ;;  %v168_v43 = vrot.slane %v167_v40, 1 }
 0x2d9   :  { %v169_v44 = vadd.f32 %v168_v43, %v167_v40 }
 0x2db   :  { %230 = vpush %v169_v44 }
 0x2dc   :  { %232 = vpush %v179_v46 }
 0x2dd   :  { %234 = vpush %v246_v45 }
 0x308   :  { %s229_s0 = spop %228 }
 0x30c   :  { %s231_s12 = spop %230 }
 0x30d   :  { %s233_s13 = spop %232 }
 0x30e   :  { %s181_s14 = sadd.f32 %s233_s13, %s231_s12  ;;  %s235_s16 = spop %234 }
 0x310   :  { %s199_s15 = smul.f32 0.02, %s181_s14 }
 0x312   :  { %s200_s17 = sadd.f32 %s229_s0, %s199_s15 }
 0x314   :  { %s201_s18 = smul.f32 %s235_s16, %s200_s17 }
 0x316   :  { %203 = sst [smem:[#allocation10]] %s201_s18 }
 0x317   :  { %300 = shalt.err (!%p297_p4)
}
 0x318   :  { %s311_s26 = smov [#allocation10]  }
 0x319   :  { %211 = dma.smem_to_hbm %s311_s26, 16, %s377_s3, [#allocation7]  }
 0x31a   :  { %305 = dma.done.wait [#allocation7], 16  }
 0x31b   :  { %306 = vsyncadd [#allocation7], 4294967280 }
 0x31c   :  { %215 = sfence }
 0x31d   :  { %216 = vsyncpa [#allocation6], 1 }
 0x31e   :  { %217 = vsyncpa [#allocation9], 1 }
 0x31f   :  { %218 = vsyncpa [#allocation7], 1 }

</bundles_post_ra>
